<compile_context>
chip_gen: v6e
topology: v6e:2x2x1
jax: 0.10.0
libtpu: 0.0.40
codegen_flags: <defaults>
</compile_context>

<pallas_src>
import jax
import jax.numpy as jnp
from jax.experimental import pallas as pl
from jax.experimental.pallas import tpu as pltpu

LANE = 128      # TPU lane width — hidden dim is padded to this
TB_MAX = 2048   # max batch-tile rows (fits trivially in scoped VMEM everywhere)


def _round_up(x, m):
    return (x + m - 1) // m * m


def _cdiv(a, b):
    return -(-a // b)


def _mlp_kernel(x_ref, w1_ref, b1_ref, w2_ref, b2_ref, o_ref):
    # x:  (TB, D_in)        w1: (D_in, H_p)      b1: (1, H_p)
    # w2: (H_p, D_out)      b2: (1, D_out)       o:  (TB, D_out)
    x = x_ref[...]
    h = jnp.dot(x, w1_ref[...], preferred_element_type=jnp.float32) + b1_ref[...]
    h = jnp.maximum(h, 0.0)                                   # ReLU on the VPU
    o_ref[...] = (jnp.dot(h, w2_ref[...], preferred_element_type=jnp.float32)
                  + b2_ref[...]).astype(o_ref.dtype)


def pad_params(w1, b1, w2, b2):
    """Pad only the hidden (lane) dim to 128.  (in, out)-layout weights.

    w1: (input_size, 30)  -> (input_size, 128)
    b1: (30,) / (1, 30)   -> (1, 128)
    w2: (30, nb_action)   -> (128, nb_action)
    b2: (nb_action,)      -> (1, nb_action)      (unpadded)
    Padded rows/columns are zero, so they contribute nothing to the dots.
    """
    _, hidden = w1.shape
    hid_p = _round_up(hidden, LANE)
    w1p = jnp.pad(w1, ((0, 0), (0, hid_p - hidden)))
    b1p = jnp.pad(jnp.reshape(b1, (1, -1)), ((0, 0), (0, hid_p - hidden)))
    w2p = jnp.pad(w2, ((0, hid_p - hidden), (0, 0)))
    b2p = jnp.reshape(b2, (1, -1))
    return w1p, b1p, w2p, b2p


@jax.jit
def network_forward(state, w1p, b1p, w2p, b2p):
    """state: (B, input_size) f32; padded params from pad_params().
    Returns (B, nb_action) Q-values — same semantics as the PyTorch module."""
    B, d_in = state.shape
    hid_p = w1p.shape[1]
    d_out = w2p.shape[1]

    # Batch tiling: pad B to a sublane multiple, then to a multiple of the tile.
    bp8 = _round_up(max(B, 8), 8)
    if bp8 >= 16:
        # at least 2 grid steps so v7x's second TensorCore is used
        n_tiles = max(2, _cdiv(bp8, TB_MAX))
    else:
        n_tiles = 1
    tb = min(_round_up(_cdiv(bp8, n_tiles), 8), TB_MAX)
    bp = _round_up(bp8, tb)

    # Only batch-row padding (no feature-dim padding); no-op when bp == B.
    xp = jnp.pad(state, ((0, bp - B), (0, 0)))

    out = pl.pallas_call(
        _mlp_kernel,
        out_shape=jax.ShapeDtypeStruct((bp, d_out), jnp.float32),
        grid=(bp // tb,),
        in_specs=[
            # activations walk the batch axis; last dim is the full (real) dim
            pl.BlockSpec((tb, d_in), lambda i: (i, 0)),
            # weights / biases: constant index_map -> VMEM-resident across steps
            pl.BlockSpec((d_in, hid_p), lambda i: (0, 0)),
            pl.BlockSpec((1, hid_p), lambda i: (0, 0)),
            pl.BlockSpec((hid_p, d_out), lambda i: (0, 0)),
            pl.BlockSpec((1, d_out), lambda i: (0, 0)),
        ],
        # real nb_action lanes: masked store, but 32x fewer output HBM bytes
        out_specs=pl.BlockSpec((tb, d_out), lambda i: (i, 0)),
        compiler_params=pltpu.CompilerParams(
            dimension_semantics=("parallel",),   # shard batch across v7x's 2 TCs
        ),
    )(xp, w1p, b1p, w2p, b2p)

    # Only batch padding to strip (no lane slice needed any more).
    return out[:B]


def init_params(key, input_size, nb_action, hidden=30):
    """Mimics torch.nn.Linear default init (U[-1/sqrt(fan_in), +1/sqrt(fan_in)]).
    Weights in (in, out) layout; biases shaped (1, out)."""
    k1, k2, k3, k4 = jax.random.split(key, 4)
    lim1 = 1.0 / jnp.sqrt(jnp.float32(input_size))
    lim2 = 1.0 / jnp.sqrt(jnp.float32(hidden))
    w1 = jax.random.uniform(k1, (input_size, hidden), jnp.float32, -lim1, lim1)
    b1 = jax.random.uniform(k2, (1, hidden), jnp.float32, -lim1, lim1)
    w2 = jax.random.uniform(k3, (hidden, nb_action), jnp.float32, -lim2, lim2)
    b2 = jax.random.uniform(k4, (1, nb_action), jnp.float32, -lim2, lim2)
    return w1, b1, w2, b2


if __name__ == "__main__":
    key = jax.random.PRNGKey(0)
    k_params, k_x1, k_x2 = jax.random.split(key, 3)

    input_size, nb_action = 16, 4
    w1, b1, w2, b2 = init_params(k_params, input_size, nb_action)
    w1p, b1p, w2p, b2p = pad_params(w1, b1, w2, b2)   # pad once, reuse forever

    def ref_forward(x):
        return jnp.maximum(x @ w1 + b1, 0.0) @ w2 + b2

    # Small batch (single-tile path).
    state_a = jax.random.normal(k_x1, (8, input_size), jnp.float32)
    q_a = network_forward(state_a, w1p, b1p, w2p, b2p)
    jax.block_until_ready(q_a)
    assert q_a.shape == (8, nb_action)
    assert jnp.allclose(q_a, ref_forward(state_a), atol=1e-5), "mismatch (B=8)"

    # Non-multiple-of-8 batch (exercises batch padding + >=2 grid steps).
    state_b = jax.random.normal(k_x2, (37, input_size), jnp.float32)
    q_b = network_forward(state_b, w1p, b1p, w2p, b2p)
    jax.block_until_ready(q_b)
    assert q_b.shape == (37, nb_action)
    assert jnp.allclose(q_b, ref_forward(state_b), atol=1e-5), "mismatch (B=37)"

    print("KERNEL_OK")
</pallas_src>

<mosaic_0001>
module attributes {stable_mosaic.version = 11 : i64} {
  func.func @_mlp_kernel(%arg0: i32, %arg1: memref<8x16xf32, #tpu.memory_space<vmem>>, %arg2: memref<16x128xf32, #tpu.memory_space<vmem>>, %arg3: memref<1x128xf32, #tpu.memory_space<vmem>>, %arg4: memref<128x4xf32, #tpu.memory_space<vmem>>, %arg5: memref<1x4xf32, #tpu.memory_space<vmem>>, %arg6: memref<8x4xf32, #tpu.memory_space<vmem>>) attributes {dimension_semantics = [#tpu.dimension_semantics<parallel>], iteration_bounds = array<i64: 1>, scalar_prefetch = 0 : i64, scratch_operands = 0 : i64, tpu.core_type = #tpu.core_type<tc>, window_params = [{transform_indices = @transform_0, window_bounds = array<i64: 8, 16>}, {pipeline_mode = #tpu.pipeline_mode<synchronous>, transform_indices = @transform_1, window_bounds = array<i64: 16, 128>}, {pipeline_mode = #tpu.pipeline_mode<synchronous>, transform_indices = @transform_2, window_bounds = array<i64: 1, 128>}, {pipeline_mode = #tpu.pipeline_mode<synchronous>, transform_indices = @transform_3, window_bounds = array<i64: 128, 4>}, {pipeline_mode = #tpu.pipeline_mode<synchronous>, transform_indices = @transform_4, window_bounds = array<i64: 1, 4>}, {transform_indices = @transform_5, window_bounds = array<i64: 8, 4>}]} {
    %c0 = arith.constant 0 : index
    %c0_0 = arith.constant 0 : index
    %0 = vector.load %arg1[%c0, %c0_0] : memref<8x16xf32, #tpu.memory_space<vmem>>, vector<8x16xf32>
    %c0_1 = arith.constant 0 : index
    %c0_2 = arith.constant 0 : index
    %1 = vector.load %arg2[%c0_1, %c0_2] : memref<16x128xf32, #tpu.memory_space<vmem>>, vector<16x128xf32>
    %cst = arith.constant dense<0.000000e+00> : vector<8x128xf32>
    %2 = tpu.matmul %0, %1, %cst {dimension_numbers = #tpu.dot_dimension_numbers<[1], [0], [0], [1], [0, 0, 1, 1], [], []>} : vector<8x16xf32>, vector<16x128xf32>, vector<8x128xf32> -> vector<8x128xf32>
    %c0_3 = arith.constant 0 : index
    %c0_4 = arith.constant 0 : index
    %3 = vector.load %arg3[%c0_3, %c0_4] : memref<1x128xf32, #tpu.memory_space<vmem>>, vector<1x128xf32>
    %4 = vector.broadcast %3 : vector<1x128xf32> to vector<8x128xf32>
    %5 = arith.addf %2, %4 : vector<8x128xf32>
    %cst_5 = arith.constant 0.000000e+00 : f32
    %6 = vector.broadcast %cst_5 : f32 to vector<8x128xf32>
    %7 = arith.maximumf %5, %6 : vector<8x128xf32>
    %c0_6 = arith.constant 0 : index
    %c0_7 = arith.constant 0 : index
    %8 = vector.load %arg4[%c0_6, %c0_7] : memref<128x4xf32, #tpu.memory_space<vmem>>, vector<128x4xf32>
    %cst_8 = arith.constant dense<0.000000e+00> : vector<8x4xf32>
    %9 = tpu.matmul %7, %8, %cst_8 {dimension_numbers = #tpu.dot_dimension_numbers<[1], [0], [0], [1], [0, 0, 1, 1], [], []>} : vector<8x128xf32>, vector<128x4xf32>, vector<8x4xf32> -> vector<8x4xf32>
    %c0_9 = arith.constant 0 : index
    %c0_10 = arith.constant 0 : index
    %10 = vector.load %arg5[%c0_9, %c0_10] : memref<1x4xf32, #tpu.memory_space<vmem>>, vector<1x4xf32>
    %11 = vector.broadcast %10 : vector<1x4xf32> to vector<8x4xf32>
    %12 = arith.addf %9, %11 : vector<8x4xf32>
    %c0_11 = arith.constant 0 : index
    %c0_12 = arith.constant 0 : index
    %13 = vector.load %arg6[%c0_11, %c0_12] : memref<8x4xf32, #tpu.memory_space<vmem>>, vector<8x4xf32>
    tpu.vector_store %arg6[%c0_11, %c0_12], %12 {strides = array<i32>} : memref<8x4xf32, #tpu.memory_space<vmem>>, vector<8x4xf32>,
    return
  }
  func.func @transform_0(%arg0: i32) -> (i32, i32) {
    %c0_i32 = arith.constant 0 : i32
    %c0_i32_0 = arith.constant 0 : i32
    return %arg0, %c0_i32 : i32, i32
  }
  func.func @transform_1(%arg0: i32) -> (i32, i32) {
    %c0_i32 = arith.constant 0 : i32
    %c0_i32_0 = arith.constant 0 : i32
    %c0_i32_1 = arith.constant 0 : i32
    return %c0_i32, %c0_i32_0 : i32, i32
  }
  func.func @transform_2(%arg0: i32) -> (i32, i32) {
    %c0_i32 = arith.constant 0 : i32
    %c0_i32_0 = arith.constant 0 : i32
    %c0_i32_1 = arith.constant 0 : i32
    return %c0_i32, %c0_i32_0 : i32, i32
  }
  func.func @transform_3(%arg0: i32) -> (i32, i32) {
    %c0_i32 = arith.constant 0 : i32
    %c0_i32_0 = arith.constant 0 : i32
    %c0_i32_1 = arith.constant 0 : i32
    return %c0_i32, %c0_i32_0 : i32, i32
  }
  func.func @transform_4(%arg0: i32) -> (i32, i32) {
    %c0_i32 = arith.constant 0 : i32
    %c0_i32_0 = arith.constant 0 : i32
    %c0_i32_1 = arith.constant 0 : i32
    return %c0_i32, %c0_i32_0 : i32, i32
  }
  func.func @transform_5(%arg0: i32) -> (i32, i32) {
    %c0_i32 = arith.constant 0 : i32
    %c0_i32_0 = arith.constant 0 : i32
    return %arg0, %c0_i32 : i32, i32
  }
}

</mosaic_0001>

<bundles_post_ra>
// kernel: network_forward.1
= control target key start
LH: loop header
LB: loop body
LE: loop exit
PB: predicated region body
PF: predicated region fallthrough
CT: control target
= control target key end

     0   :  { %v271_v0 = vmov 0.0   ;;  %vm272_vm0 = vmmov 0   ;;  %vm30_vm1 = vcmask 130048   ;;  %vm198_vm2 = vcmask 31744   ;;  %s371_s1 = inlined_call_operand.vmem [shape: f32[16,128], index: 1, kind: input, shape index: {}]   ;;  %s372_s0 = inlined_call_operand.vmem [shape: f32[8,16], index: 0, kind: input, shape index: {}]   ;;  %s373_s3 = inlined_call_operand.vmem [shape: f32[128,4], index: 3, kind: input, shape index: {}]   ;;  %s374_s2 = inlined_call_operand.vmem [shape: f32[1,128], index: 2, kind: input, shape index: {}]   ;;  %s375_s4 = inlined_call_operand.vmem [shape: f32[1,4], index: 4, kind: input, shape index: {}]   ;;  %s376_s5 = inlined_call_operand.vmem [shape: f32[8,4], index: 5, kind: output, shape index: {}]  }
   0x1   :  { %227 = vmatprep.subr.mxu0 %v271_v0  ;;  %v22_v1 = vld [vmem:[%s371_s1 + $0x8] sm:$0xff]  ;;  %v21_v2 = vld [vmem:[%s371_s1] sm:$0xff]  ;;  %231 = vmatprep.mubr.msk.f32.mxu0 %vm272_vm0, %v271_v0  ;;  %v120_v4 = vld [vmem:[%s373_s3 + $0x78] sm:$0xff] }
   0x2   :  { %228 = vmatpush3.msra.mxu0 %v22_v1  ;;  %v20_v3 = vld [vmem:[%s372_s0] sm:$0xff]  ;;  %234 = vmatprep.subr.mxu1 %v271_v0  ;;  %v119_v5 = vld [vmem:[%s373_s3 + $0x70] sm:$0xff]  ;;  %v118_v6 = vld [vmem:[%s373_s3 + $0x68] sm:$0xff] }
   0x3   :  { %229 = vmatprep.subr.mxu0 %v271_v0  ;;  %235 = vmatpush3.msra.mxu1 %v120_v4  ;;  %v117_v7 = vld [vmem:[%s373_s3 + $0x60] sm:$0xff]  ;;  %v116_v8 = vld [vmem:[%s373_s3 + $0x58] sm:$0xff]  ;;  %v115_v9 = vld [vmem:[%s373_s3 + $0x50] sm:$0xff] }
   0x4   :  { %230 = vmatpush3.msra.mxu0 %v21_v2  ;;  %236 = vmatprep.subr.mxu1 %v271_v0  ;;  %v114_v10 = vld [vmem:[%s373_s3 + $0x48] sm:$0xff]  ;;  %v113_v11 = vld [vmem:[%s373_s3 + $0x40] sm:$0xff]  ;;  %v112_v12 = vld [vmem:[%s373_s3 + $0x38] sm:$0xff] }
   0x5   :  { %232 = vmatmul.mubr.msk.f32.vlgmr.msra.gmra.mxu0 %vm30_vm1, %v20_v3  ;;  %237 = vmatpush3.msra.mxu1 %v119_v5  ;;  %v111_v13 = vld [vmem:[%s373_s3 + $0x30] sm:$0xff]  ;;  %v110_v14 = vld [vmem:[%s373_s3 + $0x28] sm:$0xff]  ;;  %v109_v15 = vld [vmem:[%s373_s3 + $0x20] sm:$0xff] }
   0x6   :  { %238 = vmatprep.subr.mxu1 %v271_v0  ;;  %266 = vmatprep.mubr.msk.f32.mxu1 %vm272_vm0, %v271_v0  ;;  %v108_v16 = vld [vmem:[%s373_s3 + $0x18] sm:$0xff]  ;;  %v107_v17 = vld [vmem:[%s373_s3 + $0x10] sm:$0xff]  ;;  %v106_v18 = vld [vmem:[%s373_s3 + $0x8] sm:$0xff] }
   0x7   :  { %239 = vmatpush3.msra.mxu1 %v118_v6  ;;  %v105_v19 = vld [vmem:[%s373_s3] sm:$0xff] }
   0x8   :  { %240 = vmatprep.subr.mxu1 %v271_v0  ;;  %v204_v20 = vld [vmem:[%s374_s2] ss:$0 sm:$0xff] }
   0x9   :  { %241 = vmatpush3.msra.mxu1 %v117_v7  ;;  %v206_v25 = vld [vmem:[%s375_s4] ss:$0 sm:$0xff] }
   0xa   :  { %242 = vmatprep.subr.mxu1 %v271_v0 }
   0xb   :  { %243 = vmatpush3.msra.mxu1 %v116_v8 }
   0xc   :  { %244 = vmatprep.subr.mxu1 %v271_v0 }
   0xd   :  { %245 = vmatpush3.msra.mxu1 %v115_v9 }
   0xe   :  { %246 = vmatprep.subr.mxu1 %v271_v0 }
   0xf   :  { %247 = vmatpush3.msra.mxu1 %v114_v10 }
  0x10   :  { %248 = vmatprep.subr.mxu1 %v271_v0 }
  0x11   :  { %249 = vmatpush3.msra.mxu1 %v113_v11 }
  0x12   :  { %250 = vmatprep.subr.mxu1 %v271_v0 }
  0x13   :  { %251 = vmatpush3.msra.mxu1 %v112_v12 }
  0x14   :  { %252 = vmatprep.subr.mxu1 %v271_v0 }
  0x15   :  { %253 = vmatpush3.msra.mxu1 %v111_v13 }
  0x16   :  { %254 = vmatprep.subr.mxu1 %v271_v0 }
  0x17   :  { %255 = vmatpush3.msra.mxu1 %v110_v14 }
  0x18   :  { %256 = vmatprep.subr.mxu1 %v271_v0 }
  0x19   :  { %257 = vmatpush3.msra.mxu1 %v109_v15 }
  0x1a   :  { %258 = vmatprep.subr.mxu1 %v271_v0 }
  0x1b   :  { %259 = vmatpush3.msra.mxu1 %v108_v16 }
  0x1c   :  { %260 = vmatprep.subr.mxu1 %v271_v0 }
  0x1d   :  { %261 = vmatpush3.msra.mxu1 %v107_v17 }
  0x1e   :  { %262 = vmatprep.subr.mxu1 %v271_v0 }
  0x1f   :  { %263 = vmatpush3.msra.mxu1 %v106_v18 }
  0x20   :  { %264 = vmatprep.subr.mxu1 %v271_v0 }
  0x21   :  { %265 = vmatpush3.msra.mxu1 %v105_v19 }
  0xc5   :  { %v100_v21 = vpop.f32.mrf.mxu0 }
  0xc6   :  { %v101_v22 = vadd.f32 %v204_v20, %v100_v21 }
  0xc7   :  { %v233_v23 = vpop.f32.mrf.mxu0 }
  0xc8   :  { %v104_v24 = vmax.f32 %v101_v22, 0.0 }
  0xca   :  { %267 = vmatmul.mubr.f32.vlgmr.msra.gmra.mxu1 %v104_v24 }
 0x18a   :  { %v194_v26 = vpop.f32.mrf.mxu1 }
 0x18b   :  { %v195_v27 = vadd.f32 %v206_v25, %v194_v26 }
 0x18c   :  { %v268_v28 = vpop.f32.mrf.mxu1 }
 0x18d   :  { %199 = vst.msk [vmem:[%s376_s5] sm:$0xff] %vm198_vm2, %v195_v27 }

</bundles_post_ra>
